<compile_context>
chip_gen: v5e
topology: v5e:2x2
jax: 0.10.0
libtpu: 0.0.40
codegen_flags: <defaults>
</compile_context>

<pallas_src>
import jax
import jax.numpy as jnp
from jax.experimental import pallas as pl
from jax.experimental.pallas import tpu as pltpu


def _round_up(x, m):
    return ((x + m - 1) // m) * m


def _cls_outputs_kernel(x_ref, w_ref, b_ref, out_ref):
    # x_ref: (TILE_N, D) f32, w_ref: (D, C_pad) bf16, b_ref: (1, C_pad) f32.
    # Cast x to bf16 in-register (no HBM pre-pass); accumulate the matmul in f32.
    x = x_ref[...].astype(jnp.bfloat16)
    logits = jnp.dot(x, w_ref[...], preferred_element_type=jnp.float32)
    # Padded class columns carry a -1e30 bias -> exp() underflows to exactly 0,
    # so no explicit column mask is needed and pad columns of the output are 0.
    logits = logits + b_ref[...]

    m = jnp.max(logits, axis=-1, keepdims=True)          # per-row numerical stability
    e = jnp.exp(logits - m)
    denom = jnp.sum(e, axis=-1, keepdims=True)
    # Exact division so per-row probabilities sum to 1 to f32 precision.
    out_ref[...] = (e / denom).astype(out_ref.dtype)


def prepare_cls_params(w_cls_t, b_cls):
    """One-time setup (hoisted out of the forward pass).

    w_cls_t: (dim_in, num_classes) f32  (nn.Linear weight, pre-transposed)
    b_cls:   (num_classes,) f32
    Returns (w_p, b_p): class dim padded to a multiple of 128, W cast to bf16,
    and the class mask baked into the bias (-1e30 on padded columns).
    """
    dim_in, num_classes = w_cls_t.shape
    c_pad = _round_up(num_classes, 128)
    w_p = jnp.zeros((dim_in, c_pad), jnp.bfloat16).at[:, :num_classes].set(
        w_cls_t.astype(jnp.bfloat16))
    b_p = jnp.full((1, c_pad), -1e30, jnp.float32).at[:, :num_classes].set(
        b_cls.astype(jnp.float32).reshape(1, num_classes))
    return w_p, b_p


def cls_outputs_forward(x, w_p, b_p, *, max_tile_n=512):
    """Eval-mode forward: softmax(x @ W^T + b, axis=1).

    x:   (N, dim_in) or (N, dim_in, 1, 1) float32 -- consumed directly, no pad pass.
    w_p, b_p: output of `prepare_cls_params` (constant across calls).
    Returns (N, c_pad) f32 probabilities; columns >= num_classes are exactly 0.
    """
    if x.ndim == 4:
        x = x.reshape(x.shape[0], x.shape[1])              # squeeze(3).squeeze(2)
    x = x.astype(jnp.float32)
    n, dim_in = x.shape
    c_pad = w_p.shape[1]

    # Row tile: large for mem-bound throughput, but aim for >= 2 balanced grid
    # steps when N allows so the row axis can shard across v7x's 2 TensorCores.
    if n <= 8:
        tile_n = n                                          # full-dim block is legal
    else:
        tile_n = min(max_tile_n, _round_up(-(-n // 2), 8))  # ~N/2, multiple of 8
    grid = pl.cdiv(n, tile_n)                               # ragged last tile is OK

    out = pl.pallas_call(
        _cls_outputs_kernel,
        out_shape=jax.ShapeDtypeStruct((n, c_pad), jnp.float32),
        grid_spec=pltpu.PrefetchScalarGridSpec(
            num_scalar_prefetch=0,
            grid=(grid,),
            in_specs=[
                pl.BlockSpec((tile_n, dim_in), lambda i: (i, 0)),  # pipelined x tiles
                pl.BlockSpec((dim_in, c_pad), lambda i: (0, 0)),   # resident weights
                pl.BlockSpec((1, c_pad), lambda i: (0, 0)),        # resident bias
            ],
            out_specs=pl.BlockSpec((tile_n, c_pad), lambda i: (i, 0)),
        ),
        compiler_params=pltpu.CompilerParams(
            dimension_semantics=("parallel",),   # independent row tiles (megacore)
        ),
    )(x, w_p, b_p)
    return out


def init_params(key, dim_in, num_classes):
    """Deterministic init matching the module's _init_weights (std=0.01, bias=0)."""
    # PyTorch nn.Linear weight is (out, in); store transposed (in, out).
    w_cls = 0.01 * jax.random.normal(key, (num_classes, dim_in), jnp.float32)
    b_cls = jnp.zeros((num_classes,), jnp.float32)
    return w_cls.T, b_cls


if __name__ == "__main__":
    key = jax.random.PRNGKey(0)
    kx, kw = jax.random.split(key)

    N = 8             # number of RoIs
    DIM_IN = 32       # input feature dim
    NUM_CLASSES = 16  # cfg.MODEL.NUM_CLASSES (synthetic)

    # 4-D input (N, dim_in, 1, 1) as produced by the preceding RoI head.
    x = jax.random.normal(kx, (N, DIM_IN, 1, 1), jnp.float32)
    w_cls_t, b_cls = init_params(kw, DIM_IN, NUM_CLASSES)

    # One-time parameter prep (hoisted out of the per-call forward).
    w_p, b_p = prepare_cls_params(w_cls_t, b_cls)

    cls_prob_padded = cls_outputs_forward(x, w_p, b_p)      # (N, 128), pad cols == 0
    jax.block_until_ready(cls_prob_padded)

    cls_prob = cls_prob_padded[:, :NUM_CLASSES]             # module-shaped view

    # Reference check in plain JAX (f32); tolerance loosened for the bf16 matmul.
    x2 = x.reshape(N, DIM_IN)
    ref_cls = jax.nn.softmax(x2 @ w_cls_t + b_cls, axis=1)
    assert cls_prob.shape == (N, NUM_CLASSES)
    assert jnp.allclose(cls_prob, ref_cls, atol=2e-2)
    assert jnp.allclose(jnp.sum(cls_prob, axis=1), 1.0, atol=1e-3)
    assert jnp.all(cls_prob_padded[:, NUM_CLASSES:] == 0.0)

    # TODO(synk): training path (raw logits, no softmax) is a trivial variant and
    # is not exercised here; detectron_weight_mapping is bookkeeping, not kernel work.
    print("KERNEL_OK")
</pallas_src>

<mosaic_0001>
module attributes {stable_mosaic.version = 11 : i64} {
  func.func @_cls_outputs_kernel(%arg0: i32, %arg1: memref<8x32xf32, #tpu.memory_space<vmem>>, %arg2: memref<32x128xbf16, #tpu.memory_space<vmem>>, %arg3: memref<1x128xf32, #tpu.memory_space<vmem>>, %arg4: memref<8x128xf32, #tpu.memory_space<vmem>>) attributes {dimension_semantics = [#tpu.dimension_semantics<parallel>], iteration_bounds = array<i64: 1>, scalar_prefetch = 0 : i64, scratch_operands = 0 : i64, tpu.core_type = #tpu.core_type<tc>, window_params = [{transform_indices = @transform_0, window_bounds = array<i64: 8, 32>}, {pipeline_mode = #tpu.pipeline_mode<synchronous>, transform_indices = @transform_1, window_bounds = array<i64: 32, 128>}, {pipeline_mode = #tpu.pipeline_mode<synchronous>, transform_indices = @transform_2, window_bounds = array<i64: 1, 128>}, {transform_indices = @transform_3, window_bounds = array<i64: 8, 128>}]} {
    %c0 = arith.constant 0 : index
    %c0_0 = arith.constant 0 : index
    %0 = vector.load %arg1[%c0, %c0_0] : memref<8x32xf32, #tpu.memory_space<vmem>>, vector<8x32xf32>
    %1 = arith.truncf %0 : vector<8x32xf32> to vector<8x32xbf16>
    %c0_1 = arith.constant 0 : index
    %c0_2 = arith.constant 0 : index
    %2 = vector.load %arg2[%c0_1, %c0_2] : memref<32x128xbf16, #tpu.memory_space<vmem>>, vector<32x128xbf16>
    %cst = arith.constant dense<0.000000e+00> : vector<8x128xf32>
    %3 = tpu.matmul %1, %2, %cst {dimension_numbers = #tpu.dot_dimension_numbers<[1], [0], [0], [1], [0, 0, 1, 1], [], []>} : vector<8x32xbf16>, vector<32x128xbf16>, vector<8x128xf32> -> vector<8x128xf32>
    %c0_3 = arith.constant 0 : index
    %c0_4 = arith.constant 0 : index
    %4 = vector.load %arg3[%c0_3, %c0_4] : memref<1x128xf32, #tpu.memory_space<vmem>>, vector<1x128xf32>
    %5 = vector.broadcast %4 : vector<1x128xf32> to vector<8x128xf32>
    %6 = arith.addf %3, %5 : vector<8x128xf32>
    %cst_5 = arith.constant dense<0xFF800000> : vector<8xf32>
    %7 = vector.multi_reduction <maximumf>, %6, %cst_5 [1] : vector<8x128xf32> to vector<8xf32>
    %8 = vector.shape_cast %7 : vector<8xf32> to vector<8x1xf32>
    %9 = vector.broadcast %8 : vector<8x1xf32> to vector<8x128xf32>
    %10 = arith.subf %6, %9 : vector<8x128xf32>
    %11 = math.exp %10 : vector<8x128xf32>
    %cst_6 = arith.constant dense<0.000000e+00> : vector<8xf32>
    %12 = vector.multi_reduction <add>, %11, %cst_6 [1] : vector<8x128xf32> to vector<8xf32>
    %13 = vector.shape_cast %12 : vector<8xf32> to vector<8x1xf32>
    %14 = vector.broadcast %13 : vector<8x1xf32> to vector<8x128xf32>
    %15 = arith.divf %11, %14 : vector<8x128xf32>
    %c0_7 = arith.constant 0 : index
    %c0_8 = arith.constant 0 : index
    %16 = vector.load %arg4[%c0_7, %c0_8] : memref<8x128xf32, #tpu.memory_space<vmem>>, vector<8x128xf32>
    tpu.vector_store %arg4[%c0_7, %c0_8], %15 {strides = array<i32>} : memref<8x128xf32, #tpu.memory_space<vmem>>, vector<8x128xf32>,
    return
  }
  func.func @transform_0(%arg0: i32) -> (i32, i32) {
    %c0_i32 = arith.constant 0 : i32
    %c0_i32_0 = arith.constant 0 : i32
    return %arg0, %c0_i32 : i32, i32
  }
  func.func @transform_1(%arg0: i32) -> (i32, i32) {
    %c0_i32 = arith.constant 0 : i32
    %c0_i32_0 = arith.constant 0 : i32
    %c0_i32_1 = arith.constant 0 : i32
    return %c0_i32, %c0_i32_0 : i32, i32
  }
  func.func @transform_2(%arg0: i32) -> (i32, i32) {
    %c0_i32 = arith.constant 0 : i32
    %c0_i32_0 = arith.constant 0 : i32
    %c0_i32_1 = arith.constant 0 : i32
    return %c0_i32, %c0_i32_0 : i32, i32
  }
  func.func @transform_3(%arg0: i32) -> (i32, i32) {
    %c0_i32 = arith.constant 0 : i32
    %c0_i32_0 = arith.constant 0 : i32
    return %arg0, %c0_i32 : i32, i32
  }
}

</mosaic_0001>

<bundles_post_ra>
// kernel: tpu_custom_call.1
= control target key start
LH: loop header
LB: loop body
LE: loop exit
PB: predicated region body
PF: predicated region fallthrough
CT: control target
= control target key end

     0   :  { %8 = vsyncpa [#allocation3], 0  ;;  %s262_s0 = inlined_call_operand.hbm [shape: f32[8,32], index: 0, kind: input, shape index: {}]   ;;  %s263_s1 = inlined_call_operand.hbm [shape: bf16[32,128], index: 1, kind: input, shape index: {}]   ;;  %s264_s2 = inlined_call_operand.vmem [shape: f32[1,128], index: 2, kind: input, shape index: {}]   ;;  %s265_s3 = inlined_call_operand.hbm [shape: f32[8,128], index: 3, kind: output, shape index: {}]  }
   0x1   :  { %9 = vsyncpa [#allocation6], 0 }
   0x2   :  { %10 = vsyncpa [#allocation4], 0  ;;  %s16_s14 = sshll.u32 %s262_s0, 4  ;;  %s225_s15 = smov [#allocation2]   ;;  %s17_s14 = int_to_ptr.hbm [resolvable:$true] %s16_s14 }
   0x3   :  { %s18_s16 = sshll.u32 %s225_s15, 4  ;;  %s26_s19 = sshll.u32 %s263_s1, 4  ;;  %s19_s16 = int_to_ptr.vmem [resolvable:$true] %s18_s16  ;;  %s27_s19 = int_to_ptr.hbm [resolvable:$true] %s26_s19 }
   0x4   :  { %21 = dma.hbm_to_vmem [thread:$0]  %s17_s14, 128, %s19_s16, [#allocation3]  }
   0x5   :  { %s226_s20 = smov [#allocation5]   ;;  %s227_s22 = smov 64  }
   0x6   :  { %s28_s21 = sshll.u32 %s226_s20, 4  ;;  %s228_s23 = smov 4   ;;  %s29_s21 = int_to_ptr.vmem [resolvable:$true] %s28_s21 }
   0x7   :  { %34 = dma.hbm_to_vmem [thread:$0]  %s27_s19, 256, %s29_s21, [#allocation6], %s227_s22, %s227_s22, %s228_s23  }
   0x8   :  { %219 = dma.done.wait [#allocation3], 128  }
   0x9   :  { %220 = vsyncadd [#allocation3], 4294967168 }
   0xa   :  { %221 = dma.done.wait [#allocation6], 256  }
   0xb   :  { %222 = vsyncadd [#allocation6], 4294967040  ;;  %v136_v0 = vld [vmem:[#allocation5 + $0x8] sm:$0xff]  ;;  %v135_v1 = vld [vmem:[#allocation5] sm:$0xff]  ;;  %vm68_vm0 = vcmask 261120   ;;  %s115_s27 = sshll.u32 %s265_s3, 4  ;;  %s116_s27 = int_to_ptr.hbm [resolvable:$true] %s115_s27 }
   0xc   :  { %78 = vmatpush.bf16.msra.mxu0 %v136_v0  ;;  %v46_v2 = vld [vmem:[#allocation2] sm:$0xff] }
   0xd   :  { %v47_v3 = vpack.c.bf16 %v46_v2, %v46_v2  ;;  %v142_v4 = vld [vmem:[%s264_s2] ss:$0 sm:$0xff]  ;;  %s229_s2 = smov [#allocation7]  }
   0xe   :  { %s113_s24 = sshll.u32 %s229_s2, 4  ;;  %s114_s24 = int_to_ptr.vmem [resolvable:$true] %s113_s24 }
  0x10   :  { %79 = vmatpush.bf16.msra.mxu0 %v135_v1 }
  0x13   :  { %134 = vmatmul.msk.bf16.vlgmr.msra.gmra.mxu0 %vm68_vm0, %v47_v3 }
  0x90   :  { %v81_v5 = vpop.f32.mrf.mxu0 }
  0x91   :  { %v82_v6 = vadd.f32 %v142_v4, %v81_v5 }
  0x93   :  { %85 = vmax.xlane.f32.xlu0 %v82_v6 }
  0x98   :  { %v83_v7 = vpop.f32.mrf.mxu0 }
 0x106   :  { %v86_v8 = vpop.xlane.xlu0 %85 }
 0x107   :  { %v87_v9 = vsub.f32 %v82_v6, %v86_v8 }
 0x109   :  { %v88_v10 = vmul.f32 1.442695, %v87_v9 }
 0x10b   :  { %143 = vpow2.f32 %v88_v10 }
 0x111   :  { %v144_v11 = vpop.eup %143 }
 0x112   :  { %90 = vadd.xlane.f32.xlu0 %v144_v11 }
 0x185   :  { %v91_v12 = vpop.xlane.xlu0 %90 }
 0x186   :  { %145 = vrcp.f32 %v91_v12  ;;  %v103_v16 = vand.u32 2147483648, %v91_v12  ;;  %v101_v18 = vand.u32 2147483647, %v91_v12  ;;  %vm97_vm2 = vweird.f32 %v91_v12 }
 0x188   :  { %v104_v20 = vor.u32 1.1754944e-38, %v103_v16  ;;  %vm102_vm4 = vcmp.eq.f32.partialorder %v101_v18, 8.507059e+37 }
 0x18c   :  { %v146_v13 = vpop.eup %145 }
 0x18d   :  { %v93_v14 = vmul.f32 %v146_v13, %v91_v12  ;;  %vm98_vm1 = vweird.f32 %v146_v13 }
 0x18e   :  { %vm99_vm3 = vmor %vm97_vm2, %vm98_vm1 }
 0x18f   :  { %v94_v15 = vsub.f32 1.0, %v93_v14 }
 0x191   :  { %v95_v17 = vmul.f32 %v146_v13, %v94_v15 }
 0x193   :  { %v96_v19 = vadd.f32 %v146_v13, %v95_v17 }
 0x195   :  { %v100_v21 = vsel %vm99_vm3, %v146_v13, %v96_v19 }
 0x196   :  { %v105_v22 = vsel %vm102_vm4, %v104_v20, %v100_v21 }
 0x197   :  { %v106_v23 = vmul.f32 %v144_v11, %v105_v22 }
 0x199   :  { %107 = vst [vmem:[#allocation7] sm:$0xff] %v106_v23 }
 0x19a   :  { %118 = dma.vmem_to_hbm [thread:$0]  %s114_s24, 128, %s116_s27, [#allocation4]  }
 0x19b   :  { %223 = dma.done.wait [#allocation4], 128  }
 0x19c   :  { %224 = vsyncadd [#allocation4], 4294967168 }
 0x19d   :  { %123 = vsyncpa [#allocation3], 1 }
 0x19e   :  { %124 = vsyncpa [#allocation6], 1 }
 0x19f   :  { %125 = vsyncpa [#allocation4], 1 }

</bundles_post_ra>
